<compile_context>
chip_gen: v7x
topology: tpu7x:2x2x1
jax: 0.10.0
libtpu: 0.0.40
codegen_flags: <defaults>
</compile_context>

<pallas_src>
import math

import jax
import jax.numpy as jnp
from jax.experimental import pallas as pl
from jax.experimental.pallas import tpu as pltpu


def _round_up(x, m):
    return (x + m - 1) // m * m


def _cdiv(a, b):
    return (a + b - 1) // b


def _pad2d(a, rows, cols):
    pr, pc = rows - a.shape[0], cols - a.shape[1]
    if pr or pc:
        a = jnp.pad(a, ((0, pr), (0, pc)))
    return a


def _tpu_config():
    """Per-generation tiling defaults; safe fallbacks if detection fails."""
    vmem_cap = 128 * 1024 * 1024
    try:
        vmem_cap = int(pltpu.get_tpu_info().vmem_capacity_bytes)
    except Exception:
        pass
    kind = ""
    try:
        kind = jax.devices()[0].device_kind.lower()
    except Exception:
        pass

    if ("v7" in kind) or ("7x" in kind) or vmem_cap <= 64 * 1024 * 1024:
        # v7x: 64 MiB VMEM per TC, 2 TCs/chip -> modest tiles, >=2 row tiles.
        cfg = dict(tm=512, tf=512, mxu_dim=256, weight_buffers=2,
                   min_row_tiles=2, vmem_limit=56 * 1024 * 1024)
    elif "v6" in kind:
        # v6e: 128 MiB VMEM, 2x256x256 MXU -> big tiles, compute-bound weight stream.
        cfg = dict(tm=1024, tf=1024, mxu_dim=256, weight_buffers=2,
                   min_row_tiles=1, vmem_limit=104 * 1024 * 1024)
    elif "v5" in kind:
        # v5e: 4x128x128 MXU, slower HBM -> 128-aligned, big tf, deeper weight pipeline.
        cfg = dict(tm=512, tf=1024, mxu_dim=128, weight_buffers=3,
                   min_row_tiles=1, vmem_limit=100 * 1024 * 1024)
    else:
        cfg = dict(tm=512, tf=512, mxu_dim=128, weight_buffers=2,
                   min_row_tiles=1, vmem_limit=48 * 1024 * 1024)
    cfg["vmem_limit"] = min(cfg["vmem_limit"],
                            max(vmem_cap - 8 * 1024 * 1024, 16 * 1024 * 1024))
    return cfg


def _make_kernel(acc_in_output, compute_dtype):
    """Build the fused FFN kernel body.

    acc_in_output: accumulate directly into o_ref (f32 output path) instead of a scratch.
    compute_dtype: optional dtype to cast x/W1/W2 to for the MXU (keeps f32 accumulation).
    """

    def _operands(x_ref, w1_ref, w2_ref):
        x, w1, w2 = x_ref[...], w1_ref[...], w2_ref[...]
        if compute_dtype is not None and x.dtype != compute_dtype:
            x = x.astype(compute_dtype)
            w1 = w1.astype(compute_dtype)
            w2 = w2.astype(compute_dtype)
        return x, w1, w2

    def _hidden(x, w1, b1_ref):
        # linear_1 (this d_ff slice) + bias + ReLU, f32 accumulation on the MXU.
        h = jnp.dot(x, w1, preferred_element_type=jnp.float32)
        h = jnp.maximum(h + b1_ref[...].astype(jnp.float32), 0.0)
        # Dropout == identity in eval mode (see module TODO above).
        return h

    if acc_in_output:
        def kernel(x_ref, w1_ref, b1_ref, w2_ref, b2_ref, o_ref):
            k = pl.program_id(1)

            @pl.when(k == 0)
            def _init():
                o_ref[...] = jnp.broadcast_to(
                    b2_ref[...].astype(o_ref.dtype), o_ref.shape)

            x, w1, w2 = _operands(x_ref, w1_ref, w2_ref)
            h = _hidden(x, w1, b1_ref)
            o_ref[...] += jnp.dot(h.astype(w2.dtype), w2,
                                  preferred_element_type=jnp.float32)

        return kernel

    def kernel(x_ref, w1_ref, b1_ref, w2_ref, b2_ref, o_ref, acc_ref):
        k = pl.program_id(1)

        @pl.when(k == 0)
        def _init():
            acc_ref[...] = jnp.zeros_like(acc_ref)

        x, w1, w2 = _operands(x_ref, w1_ref, w2_ref)
        h = _hidden(x, w1, b1_ref)
        acc_ref[...] += jnp.dot(h.astype(w2.dtype), w2,
                                preferred_element_type=jnp.float32)

        @pl.when(k == pl.num_programs(1) - 1)
        def _finalize():
            o_ref[...] = (acc_ref[...]
                          + b2_ref[...].astype(jnp.float32)).astype(o_ref.dtype)

    return kernel


def feed_forward(x, w1, b1, w2, b2, *, tm=None, tf=None, mxu_dim=None,
                 vmem_limit_bytes=None, compute_dtype=None):
    """y = relu(x @ W1 + b1) @ W2 + b2.

    x: (B, S, d_model); W1: (d_model, d_ff); W2: (d_ff, d_model) (transposed vs. PyTorch).
    Tiling / VMEM defaults are picked per TPU generation; override via kwargs.
    """
    cfg = _tpu_config()
    tm = cfg["tm"] if tm is None else tm
    tf = cfg["tf"] if tf is None else tf
    mxu_dim = cfg["mxu_dim"] if mxu_dim is None else mxu_dim
    vmem_limit_bytes = cfg["vmem_limit"] if vmem_limit_bytes is None else vmem_limit_bytes
    weight_buffers = cfg["weight_buffers"]
    min_row_tiles = cfg["min_row_tiles"]

    B, S, d_model = x.shape
    d_ff = w1.shape[1]
    M = B * S

    out_dtype = x.dtype
    acc_in_output = (out_dtype == jnp.float32)   # accumulate straight into o_ref
    in_isz = x.dtype.itemsize
    out_isz = in_isz
    w_isz = w1.dtype.itemsize

    # ---- tile sizing (sublane / MXU aligned, clipped for small problems) ----
    sublane = 16 if x.dtype == jnp.bfloat16 else 8
    m_al = _round_up(M, sublane)
    tm_eff = _round_up(min(tm, m_al), sublane)
    # Dual-TC chips (v7x): keep >= min_row_tiles tiles on the parallel axis so no
    # TensorCore idles on small-M / decode shapes.
    if min_row_tiles > 1 and m_al >= min_row_tiles * sublane:
        tm_eff = min(tm_eff, _round_up(_cdiv(m_al, min_row_tiles), sublane))

    d_model_pad = _round_up(d_model, mxu_dim)     # lane-dense, full MXU width
    tf_eff = _round_up(min(tf, _round_up(d_ff, mxu_dim)), mxu_dim)

    # ---- shrink tiles if they would blow the VMEM budget ----
    def _vmem_need(tm_, tf_):
        return ((tm_ * d_model_pad) * (in_isz + out_isz)           # x + out (single-buffered)
                + (0 if acc_in_output else tm_ * d_model_pad * 4)  # f32 scratch (bf16 path)
                + weight_buffers * tf_ * d_model_pad * w_isz * 2   # W1 + W2 slices
                + weight_buffers * (tf_ + d_model_pad) * w_isz     # bias slices
                + tm_ * tf_ * 4)                                   # f32 hidden temp

    budget = int(0.9 * vmem_limit_bytes)
    for _ in range(16):
        if _vmem_need(tm_eff, tf_eff) <= budget:
            break
        if tf_eff > mxu_dim:
            tf_eff = max(mxu_dim, (tf_eff // 2) // mxu_dim * mxu_dim)
        elif tm_eff > sublane:
            tm_eff = max(sublane, (tm_eff // 2) // sublane * sublane)
        else:
            break

    M_pad = _round_up(M, tm_eff)
    d_ff_pad = _round_up(d_ff, tf_eff)

    # ---- zero-pad operands (no-op for already-aligned transformer shapes; for
    #      unaligned shapes called repeatedly, pre-pad weights once outside) ----
    x2d = _pad2d(x.reshape(M, d_model), M_pad, d_model_pad)
    w1p = _pad2d(w1, d_model_pad, d_ff_pad)
    w2p = _pad2d(w2, d_ff_pad, d_model_pad)
    b1p = _pad2d(b1.reshape(1, d_ff), 1, d_ff_pad)
    b2p = _pad2d(b2.reshape(1, d_model), 1, d_model_pad)

    grid = (M_pad // tm_eff, d_ff_pad // tf_eff)
    n_row_tiles = grid[0]

    # Weights (and biases) are re-streamed once per row tile.
    weight_bytes = (w1p.size * w1p.dtype.itemsize + w2p.size * w2p.dtype.itemsize
                    + b1p.size * b1p.dtype.itemsize + b2p.size * b2p.dtype.itemsize)
    cost = pl.CostEstimate(
        flops=4 * M_pad * d_model_pad * d_ff_pad,
        transcendentals=0,
        bytes_accessed=(x2d.size * x2d.dtype.itemsize
                        + M_pad * d_model_pad * out_isz
                        + n_row_tiles * weight_bytes),
    )

    kernel = _make_kernel(acc_in_output, compute_dtype)
    scratch = [] if acc_in_output else [pltpu.VMEM((tm_eff, d_model_pad), jnp.float32)]

    def _call(use_pipeline_modes):
        def spec(shape, index_map, bufs=None):
            if use_pipeline_modes and bufs is not None and bufs != 2:
                return pl.BlockSpec(shape, index_map, pipeline_mode=pl.Buffered(bufs))
            return pl.BlockSpec(shape, index_map)

        wb = weight_buffers
        in_specs = [
            # x / out block indices only change with i -> a single buffer suffices.
            spec((tm_eff, d_model_pad), lambda i, k: (i, 0), bufs=1),
            spec((d_model_pad, tf_eff), lambda i, k: (0, k), bufs=wb),   # W1 slice
            spec((1, tf_eff),           lambda i, k: (0, k), bufs=wb),   # b1 slice
            spec((tf_eff, d_model_pad), lambda i, k: (k, 0), bufs=wb),   # W2 slice
            pl.BlockSpec((1, d_model_pad), lambda i, k: (0, 0)),         # b2
        ]
        out_specs = spec((tm_eff, d_model_pad), lambda i, k: (i, 0), bufs=1)

        return pl.pallas_call(
            kernel,
            out_shape=jax.ShapeDtypeStruct((M_pad, d_model_pad), out_dtype),
            grid_spec=pltpu.PrefetchScalarGridSpec(
                num_scalar_prefetch=0,
                grid=grid,
                in_specs=in_specs,
                out_specs=out_specs,
                scratch_shapes=scratch,
            ),
            compiler_params=pltpu.CompilerParams(
                dimension_semantics=("parallel", "arbitrary"),
                vmem_limit_bytes=vmem_limit_bytes,
            ),
            cost_estimate=cost,
        )(x2d, w1p, b1p, w2p, b2p)

    try:
        out2d = _call(True)
    except Exception:
        # Fallback for environments without BlockSpec(pipeline_mode=pl.Buffered(...)).
        out2d = _call(False)

    if M_pad == M and d_model_pad == d_model:
        return out2d.reshape(B, S, d_model)
    return out2d[:M, :d_model].reshape(B, S, d_model)


def init_params(key, d_model, d_ff, dtype=jnp.float32):
    """Deterministic init mimicking nn.Linear (uniform +-1/sqrt(fan_in)).

    Weights are returned already transposed to (in, out) layout for the kernel.
    """
    k1, k2, k3, k4 = jax.random.split(key, 4)
    bound1 = 1.0 / math.sqrt(d_model)
    bound2 = 1.0 / math.sqrt(d_ff)
    w1 = jax.random.uniform(k1, (d_model, d_ff), dtype, -bound1, bound1)
    b1 = jax.random.uniform(k2, (d_ff,), dtype, -bound1, bound1)
    w2 = jax.random.uniform(k3, (d_ff, d_model), dtype, -bound2, bound2)
    b2 = jax.random.uniform(k4, (d_model,), dtype, -bound2, bound2)
    return w1, b1, w2, b2


if __name__ == "__main__":
    cfg = {"d_model": 16, "d_ff": 64, "dropout": 0.1}
    B, S = 2, 8

    key = jax.random.PRNGKey(0)
    kx, kp = jax.random.split(key)
    x = jax.random.normal(kx, (B, S, cfg["d_model"]), jnp.float32)
    w1, b1, w2, b2 = init_params(kp, cfg["d_model"], cfg["d_ff"])

    # f32 path (accumulates directly in the f32 output block)
    out = jax.block_until_ready(feed_forward(x, w1, b1, w2, b2))
    ref = jnp.maximum(x @ w1 + b1, 0.0) @ w2 + b2
    assert out.shape == (B, S, cfg["d_model"])
    assert jnp.allclose(out, ref, atol=1e-4, rtol=1e-4), float(jnp.max(jnp.abs(out - ref)))

    # bf16 path (scratch accumulator, f32 accumulation inside the kernel)
    xb, w1b, b1b, w2b, b2b = (a.astype(jnp.bfloat16) for a in (x, w1, b1, w2, b2))
    out_bf16 = jax.block_until_ready(feed_forward(xb, w1b, b1b, w2b, b2b))
    assert out_bf16.shape == (B, S, cfg["d_model"])
    assert jnp.allclose(out_bf16.astype(jnp.float32), ref, atol=1e-1, rtol=1e-1)

    print("KERNEL_OK")
</pallas_src>

<mosaic_0001>
module attributes {stable_mosaic.version = 11 : i64} {
  func.func @kernel(%arg0: i32, %arg1: i32, %arg2: memref<16x128xf32, #tpu.memory_space<vmem>>, %arg3: memref<128x128xf32, #tpu.memory_space<vmem>>, %arg4: memref<1x128xf32, #tpu.memory_space<vmem>>, %arg5: memref<128x128xf32, #tpu.memory_space<vmem>>, %arg6: memref<1x128xf32, #tpu.memory_space<vmem>>, %arg7: memref<16x128xf32, #tpu.memory_space<vmem>>) attributes {dimension_semantics = [#tpu.dimension_semantics<parallel>, #tpu.dimension_semantics<arbitrary>], iteration_bounds = array<i64: 1, 1>, scalar_prefetch = 0 : i64, scratch_operands = 0 : i64, tpu.core_type = #tpu.core_type<tc>, window_params = [{pipeline_mode = #tpu.pipeline_mode<synchronous>, transform_indices = @transform_0, window_bounds = array<i64: 16, 128>}, {transform_indices = @transform_1, window_bounds = array<i64: 128, 128>}, {transform_indices = @transform_2, window_bounds = array<i64: 1, 128>}, {transform_indices = @transform_3, window_bounds = array<i64: 128, 128>}, {pipeline_mode = #tpu.pipeline_mode<synchronous>, transform_indices = @transform_4, window_bounds = array<i64: 1, 128>}, {pipeline_mode = #tpu.pipeline_mode<synchronous>, transform_indices = @transform_5, window_bounds = array<i64: 16, 128>}]} {
    %c0_i32 = arith.constant 0 : i32
    %0 = arith.cmpi eq, %arg1, %c0_i32 : i32
    %1 = arith.extui %0 : i1 to i32
    %c0_i32_0 = arith.constant 0 : i32
    %2 = arith.cmpi ne, %1, %c0_i32_0 : i32
    scf.if %2 {
      %c0_14 = arith.constant 0 : index
      %c0_15 = arith.constant 0 : index
      %16 = vector.load %arg6[%c0_14, %c0_15] : memref<1x128xf32, #tpu.memory_space<vmem>>, vector<1x128xf32>
      %17 = vector.shape_cast %16 : vector<1x128xf32> to vector<1x128xf32>
      %18 = vector.broadcast %17 : vector<1x128xf32> to vector<16x128xf32>
      %c0_16 = arith.constant 0 : index
      %c0_17 = arith.constant 0 : index
      %19 = vector.load %arg7[%c0_16, %c0_17] : memref<16x128xf32, #tpu.memory_space<vmem>>, vector<16x128xf32>
      tpu.vector_store %arg7[%c0_16, %c0_17], %18 {strides = array<i32>} : memref<16x128xf32, #tpu.memory_space<vmem>>, vector<16x128xf32>,
    } else {
    }
    %c0 = arith.constant 0 : index
    %c0_1 = arith.constant 0 : index
    %3 = vector.load %arg2[%c0, %c0_1] : memref<16x128xf32, #tpu.memory_space<vmem>>, vector<16x128xf32>
    %c0_2 = arith.constant 0 : index
    %c0_3 = arith.constant 0 : index
    %4 = vector.load %arg3[%c0_2, %c0_3] : memref<128x128xf32, #tpu.memory_space<vmem>>, vector<128x128xf32>
    %c0_4 = arith.constant 0 : index
    %c0_5 = arith.constant 0 : index
    %5 = vector.load %arg5[%c0_4, %c0_5] : memref<128x128xf32, #tpu.memory_space<vmem>>, vector<128x128xf32>
    %cst = arith.constant dense<0.000000e+00> : vector<16x128xf32>
    %6 = tpu.matmul %3, %4, %cst {dimension_numbers = #tpu.dot_dimension_numbers<[1], [0], [0], [1], [0, 0, 1, 1], [], []>} : vector<16x128xf32>, vector<128x128xf32>, vector<16x128xf32> -> vector<16x128xf32>
    %c0_6 = arith.constant 0 : index
    %c0_7 = arith.constant 0 : index
    %7 = vector.load %arg4[%c0_6, %c0_7] : memref<1x128xf32, #tpu.memory_space<vmem>>, vector<1x128xf32>
    %8 = vector.broadcast %7 : vector<1x128xf32> to vector<16x128xf32>
    %9 = arith.addf %6, %8 : vector<16x128xf32>
    %cst_8 = arith.constant 0.000000e+00 : f32
    %10 = vector.broadcast %cst_8 : f32 to vector<16x128xf32>
    %11 = arith.maximumf %9, %10 : vector<16x128xf32>
    %c0_9 = arith.constant 0 : index
    %c0_10 = arith.constant 0 : index
    %12 = vector.load %arg7[%c0_9, %c0_10] : memref<16x128xf32, #tpu.memory_space<vmem>>, vector<16x128xf32>
    %cst_11 = arith.constant dense<0.000000e+00> : vector<16x128xf32>
    %13 = tpu.matmul %11, %5, %cst_11 {dimension_numbers = #tpu.dot_dimension_numbers<[1], [0], [0], [1], [0, 0, 1, 1], [], []>} : vector<16x128xf32>, vector<128x128xf32>, vector<16x128xf32> -> vector<16x128xf32>
    %14 = arith.addf %12, %13 : vector<16x128xf32>
    %c0_12 = arith.constant 0 : index
    %c0_13 = arith.constant 0 : index
    %15 = vector.load %arg7[%c0_12, %c0_13] : memref<16x128xf32, #tpu.memory_space<vmem>>, vector<16x128xf32>
    tpu.vector_store %arg7[%c0_12, %c0_13], %14 {strides = array<i32>} : memref<16x128xf32, #tpu.memory_space<vmem>>, vector<16x128xf32>,
    return
  }
  func.func @transform_0(%arg0: i32, %arg1: i32) -> (i32, i32) {
    %c0_i32 = arith.constant 0 : i32
    %c0_i32_0 = arith.constant 0 : i32
    return %arg0, %c0_i32 : i32, i32
  }
  func.func @transform_1(%arg0: i32, %arg1: i32) -> (i32, i32) {
    %c0_i32 = arith.constant 0 : i32
    %c0_i32_0 = arith.constant 0 : i32
    return %c0_i32, %arg1 : i32, i32
  }
  func.func @transform_2(%arg0: i32, %arg1: i32) -> (i32, i32) {
    %c0_i32 = arith.constant 0 : i32
    %c0_i32_0 = arith.constant 0 : i32
    return %c0_i32, %arg1 : i32, i32
  }
  func.func @transform_3(%arg0: i32, %arg1: i32) -> (i32, i32) {
    %c0_i32 = arith.constant 0 : i32
    %c0_i32_0 = arith.constant 0 : i32
    return %arg1, %c0_i32 : i32, i32
  }
  func.func @transform_4(%arg0: i32, %arg1: i32) -> (i32, i32) {
    %c0_i32 = arith.constant 0 : i32
    %c0_i32_0 = arith.constant 0 : i32
    %c0_i32_1 = arith.constant 0 : i32
    return %c0_i32, %c0_i32_0 : i32, i32
  }
  func.func @transform_5(%arg0: i32, %arg1: i32) -> (i32, i32) {
    %c0_i32 = arith.constant 0 : i32
    %c0_i32_0 = arith.constant 0 : i32
    return %arg0, %c0_i32 : i32, i32
  }
}

module attributes {stable_mosaic.version = 11 : i64} {
  func.func @kernel(%arg0: i32, %arg1: i32, %arg2: memref<16x128xf32, #tpu.memory_space<vmem>>, %arg3: memref<128x128xf32, #tpu.memory_space<vmem>>, %arg4: memref<1x128xf32, #tpu.memory_space<vmem>>, %arg5: memref<128x128xf32, #tpu.memory_space<vmem>>, %arg6: memref<1x128xf32, #tpu.memory_space<vmem>>, %arg7: memref<16x128xf32, #tpu.memory_space<vmem>>) attributes {dimension_semantics = [#tpu.dimension_semantics<parallel>, #tpu.dimension_semantics<arbitrary>], iteration_bounds = array<i64: 1, 1>, scalar_prefetch = 0 : i64, scratch_operands = 0 : i64, tpu.core_type = #tpu.core_type<tc>, window_params = [{transform_indices = @transform_0, window_bounds = array<i64: 16, 128>}, {transform_indices = @transform_1, window_bounds = array<i64: 128, 128>}, {transform_indices = @transform_2, window_bounds = array<i64: 1, 128>}, {transform_indices = @transform_3, window_bounds = array<i64: 128, 128>}, {pipeline_mode = #tpu.pipeline_mode<synchronous>, transform_indices = @transform_4, window_bounds = array<i64: 1, 128>}, {transform_indices = @transform_5, window_bounds = array<i64: 16, 128>}]} {
    %c0_i32 = arith.constant 0 : i32
    %0 = arith.cmpi eq, %arg1, %c0_i32 : i32
    %1 = arith.extui %0 : i1 to i32
    %c0_i32_0 = arith.constant 0 : i32
    %2 = arith.cmpi ne, %1, %c0_i32_0 : i32
    scf.if %2 {
      %c0_14 = arith.constant 0 : index
      %c0_15 = arith.constant 0 : index
      %16 = vector.load %arg6[%c0_14, %c0_15] : memref<1x128xf32, #tpu.memory_space<vmem>>, vector<1x128xf32>
      %17 = vector.shape_cast %16 : vector<1x128xf32> to vector<1x128xf32>
      %18 = vector.broadcast %17 : vector<1x128xf32> to vector<16x128xf32>
      %c0_16 = arith.constant 0 : index
      %c0_17 = arith.constant 0 : index
      %19 = vector.load %arg7[%c0_16, %c0_17] : memref<16x128xf32, #tpu.memory_space<vmem>>, vector<16x128xf32>
      tpu.vector_store %arg7[%c0_16, %c0_17], %18 {strides = array<i32>} : memref<16x128xf32, #tpu.memory_space<vmem>>, vector<16x128xf32>,
    } else {
    }
    %c0 = arith.constant 0 : index
    %c0_1 = arith.constant 0 : index
    %3 = vector.load %arg2[%c0, %c0_1] : memref<16x128xf32, #tpu.memory_space<vmem>>, vector<16x128xf32>
    %c0_2 = arith.constant 0 : index
    %c0_3 = arith.constant 0 : index
    %4 = vector.load %arg3[%c0_2, %c0_3] : memref<128x128xf32, #tpu.memory_space<vmem>>, vector<128x128xf32>
    %c0_4 = arith.constant 0 : index
    %c0_5 = arith.constant 0 : index
    %5 = vector.load %arg5[%c0_4, %c0_5] : memref<128x128xf32, #tpu.memory_space<vmem>>, vector<128x128xf32>
    %cst = arith.constant dense<0.000000e+00> : vector<16x128xf32>
    %6 = tpu.matmul %3, %4, %cst {dimension_numbers = #tpu.dot_dimension_numbers<[1], [0], [0], [1], [0, 0, 1, 1], [], []>} : vector<16x128xf32>, vector<128x128xf32>, vector<16x128xf32> -> vector<16x128xf32>
    %c0_6 = arith.constant 0 : index
    %c0_7 = arith.constant 0 : index
    %7 = vector.load %arg4[%c0_6, %c0_7] : memref<1x128xf32, #tpu.memory_space<vmem>>, vector<1x128xf32>
    %8 = vector.broadcast %7 : vector<1x128xf32> to vector<16x128xf32>
    %9 = arith.addf %6, %8 : vector<16x128xf32>
    %cst_8 = arith.constant 0.000000e+00 : f32
    %10 = vector.broadcast %cst_8 : f32 to vector<16x128xf32>
    %11 = arith.maximumf %9, %10 : vector<16x128xf32>
    %c0_9 = arith.constant 0 : index
    %c0_10 = arith.constant 0 : index
    %12 = vector.load %arg7[%c0_9, %c0_10] : memref<16x128xf32, #tpu.memory_space<vmem>>, vector<16x128xf32>
    %cst_11 = arith.constant dense<0.000000e+00> : vector<16x128xf32>
    %13 = tpu.matmul %11, %5, %cst_11 {dimension_numbers = #tpu.dot_dimension_numbers<[1], [0], [0], [1], [0, 0, 1, 1], [], []>} : vector<16x128xf32>, vector<128x128xf32>, vector<16x128xf32> -> vector<16x128xf32>
    %14 = arith.addf %12, %13 : vector<16x128xf32>
    %c0_12 = arith.constant 0 : index
    %c0_13 = arith.constant 0 : index
    %15 = vector.load %arg7[%c0_12, %c0_13] : memref<16x128xf32, #tpu.memory_space<vmem>>, vector<16x128xf32>
    tpu.vector_store %arg7[%c0_12, %c0_13], %14 {strides = array<i32>} : memref<16x128xf32, #tpu.memory_space<vmem>>, vector<16x128xf32>,
    return
  }
  func.func @transform_0(%arg0: i32, %arg1: i32) -> (i32, i32) {
    %c0_i32 = arith.constant 0 : i32
    %c0_i32_0 = arith.constant 0 : i32
    return %arg0, %c0_i32 : i32, i32
  }
  func.func @transform_1(%arg0: i32, %arg1: i32) -> (i32, i32) {
    %c0_i32 = arith.constant 0 : i32
    %c0_i32_0 = arith.constant 0 : i32
    return %c0_i32, %arg1 : i32, i32
  }
  func.func @transform_2(%arg0: i32, %arg1: i32) -> (i32, i32) {
    %c0_i32 = arith.constant 0 : i32
    %c0_i32_0 = arith.constant 0 : i32
    return %c0_i32, %arg1 : i32, i32
  }
  func.func @transform_3(%arg0: i32, %arg1: i32) -> (i32, i32) {
    %c0_i32 = arith.constant 0 : i32
    %c0_i32_0 = arith.constant 0 : i32
    return %arg1, %c0_i32 : i32, i32
  }
  func.func @transform_4(%arg0: i32, %arg1: i32) -> (i32, i32) {
    %c0_i32 = arith.constant 0 : i32
    %c0_i32_0 = arith.constant 0 : i32
    %c0_i32_1 = arith.constant 0 : i32
    return %c0_i32, %c0_i32_0 : i32, i32
  }
  func.func @transform_5(%arg0: i32, %arg1: i32) -> (i32, i32) {
    %c0_i32 = arith.constant 0 : i32
    %c0_i32_0 = arith.constant 0 : i32
    return %arg0, %c0_i32 : i32, i32
  }
}

</mosaic_0001>

<bundles_post_ra>
// kernel: tpu_custom_call.1
= control target key start
LH: loop header
LB: loop body
LE: loop exit
PB: predicated region body
PF: predicated region fallthrough
CT: control target
= control target key end

     0   :  { %10 = vsyncpa [#allocation3], 0  ;;  %s673_s0 = inlined_call_operand.hbm [shape: f32[16,128], index: 0, kind: input, shape index: {}]   ;;  %s674_s1 = inlined_call_operand.hbm [shape: f32[128,128], index: 1, kind: input, shape index: {}]   ;;  %s675_s2 = inlined_call_operand.vmem [shape: f32[1,128], index: 2, kind: input, shape index: {}]   ;;  %s676_s3 = inlined_call_operand.hbm [shape: f32[128,128], index: 3, kind: input, shape index: {}]   ;;  %s677_s4 = inlined_call_operand.vmem [shape: f32[1,128], index: 4, kind: input, shape index: {}]   ;;  %s678_s5 = inlined_call_operand.hbm [shape: f32[16,128], index: 5, kind: output, shape index: {}]  }
   0x1   :  { %11 = vsyncpa [#allocation6], 0 }
   0x2   :  { %12 = vsyncpa [#allocation4], 0  ;;  %s564_s18 = smov [#allocation5]   ;;  %s565_s20 = smov [#allocation2]  }
   0x3   :  { %s30_s19 = sshll.u32 %s564_s18, 4  ;;  %s18_s21 = sshll.u32 %s565_s20, 4  ;;  %s31_s19 = int_to_ptr.vmem [resolvable:$true] %s30_s19  ;;  %s600_s21 = int_to_ptr.vmem [resolvable:$true] %s18_s21 }
   0x4   :  { %s470_s24 = scalar_lea.hbm %s674_s1, 2048 }
   0x5   :  { %p471_p0 = scmp.ne.s32.totalorder %s674_s1, %s470_s24  ;;  %p474_p1 = scmp.lt.u32.totalorder %s470_s24, %s674_s1 }
   0x7   :  { %p476_p2 = pnand %p474_p1, %p471_p0 }
   0x9   :  { %479 = shalt.err (!%p476_p2)
}
   0xa   :  { %s480_s29 = scalar_lea.vmem %s31_s19, 2048  ;;  %p485_p4 = scmp.lt.s32.totalorder %s31_s19, %s31_s19 }
   0xb   :  { %p481_p3 = scmp.ne.s32.totalorder %s31_s19, %s480_s29  ;;  %p486_p5 = scmp.lt.s32.totalorder %s480_s29, %s480_s29 }
   0xd   :  { %p487_p6 = por %p486_p5, %p485_p4 }
   0xf   :  { %p488_p7 = pnand %p487_p6, %p481_p3 }
  0x11   :  { %491 = shalt.err (!%p488_p7)
}
  0x12   :  { %s566_s30 = smov 128   ;;  %s567_s6 = smov 8  }
  0x13   :  { %36 = dma.hbm_to_vmem [thread:$0]  %s674_s1, 2048, %s31_s19, [#allocation6], %s566_s30, %s566_s30, %s567_s6  }
  0x14   :  { %s492_s11 = scalar_lea.hbm %s673_s0, 256 }
  0x15   :  { %p493_p8 = scmp.ne.s32.totalorder %s673_s0, %s492_s11  ;;  %p496_p9 = scmp.lt.u32.totalorder %s492_s11, %s673_s0 }
  0x17   :  { %p498_p10 = pnand %p496_p9, %p493_p8 }
  0x19   :  { %501 = shalt.err (!%p498_p10)
}
  0x1a   :  { %s502_s16 = scalar_lea.vmem %s600_s21, 256  ;;  %p507_p12 = scmp.lt.s32.totalorder %s600_s21, %s600_s21 }
  0x1b   :  { %p503_p11 = scmp.ne.s32.totalorder %s600_s21, %s502_s16  ;;  %p508_p13 = scmp.lt.s32.totalorder %s502_s16, %s502_s16 }
  0x1d   :  { %p509_p0 = por %p508_p13, %p507_p12 }
  0x1f   :  { %p510_p1 = pnand %p509_p0, %p503_p11 }
  0x21   :  { %513 = shalt.err (!%p510_p1)
}
  0x22   :  { %24 = dma.hbm_to_vmem [thread:$0]  %s673_s0, 256, %s600_s21, [#allocation3], %s566_s30, %s566_s30, %s567_s6  }
  0x23   :  { %s568_s18 = smov [#allocation7]   ;;  %s514_s23 = scalar_lea.hbm %s676_s3, 2048 }
  0x24   :  { %s44_s19 = sshll.u32 %s568_s18, 4  ;;  %p515_p2 = scmp.ne.s32.totalorder %s676_s3, %s514_s23  ;;  %s45_s19 = int_to_ptr.vmem [resolvable:$true] %s44_s19 }
  0x25   :  { %p518_p3 = scmp.lt.u32.totalorder %s514_s23, %s676_s3 }
  0x27   :  { %p520_p4 = pnand %p518_p3, %p515_p2 }
  0x29   :  { %523 = shalt.err (!%p520_p4)
}
  0x2a   :  { %s524_s28 = scalar_lea.vmem %s45_s19, 2048  ;;  %p529_p6 = scmp.lt.s32.totalorder %s45_s19, %s45_s19 }
  0x2b   :  { %p525_p5 = scmp.ne.s32.totalorder %s45_s19, %s524_s28  ;;  %p530_p7 = scmp.lt.s32.totalorder %s524_s28, %s524_s28 }
  0x2d   :  { %p531_p8 = por %p530_p7, %p529_p6 }
  0x2f   :  { %p532_p9 = pnand %p531_p8, %p525_p5 }
  0x31   :  { %535 = shalt.err (!%p532_p9)
}
  0x32   :  { %50 = dma.hbm_to_vmem [thread:$0]  %s676_s3, 2048, %s45_s19, [#allocation6], %s566_s30, %s566_s30, %s567_s6  }
  0x33   :  { %558 = dma.done.wait [#allocation3], 256  }
  0x34   :  { %559 = vsyncadd [#allocation3], 4294967040 }
  0x35   :  { %560 = dma.done.wait [#allocation6], 4096  }
  0x36   :  { %561 = vsyncadd [#allocation6], 4294963200  ;;  %v77_v0 = vld [vmem:[#allocation5] sm:$0xff]  ;;  %v78_v1 = vld [vmem:[#allocation5 + $0x8] sm:$0xff]  ;;  %s569_s9 = smov [#allocation8]  }
  0x37   :  { %v79_v2 = vld [vmem:[#allocation5 + $0x10] sm:$0xff]  ;;  %v400_v3 = vpack.c.bf16 %v78_v1, %v77_v0  ;;  %v80_v4 = vld [vmem:[#allocation5 + $0x18] sm:$0xff]  ;;  %v81_v6 = vld [vmem:[#allocation5 + $0x20] sm:$0xff]  ;;  %s279_s10 = sshll.u32 %s569_s9, 4  ;;  %s280_s10 = int_to_ptr.vmem [resolvable:$true] %s279_s10 }
  0x38   :  { %v404_v5 = vpack.c.bf16 %v80_v4, %v79_v2  ;;  %v82_v7 = vld [vmem:[#allocation5 + $0x28] sm:$0xff]  ;;  %v83_v9 = vld [vmem:[#allocation5 + $0x30] sm:$0xff]  ;;  %v84_v10 = vld [vmem:[#allocation5 + $0x38] sm:$0xff]  ;;  %p541_p11 = scmp.lt.s32.totalorder %s280_s10, %s280_s10 }
  0x39   :  { %401 = vmatprep.subr.bf16.mxu0 %v400_v3  ;;  %v408_v8 = vpack.c.bf16 %v82_v7, %v81_v6  ;;  %v75_v11 = vld [vmem:[#allocation2] sm:$0xff]  ;;  %v93_v12 = vld [vmem:[#allocation7] sm:$0xff]  ;;  %v94_v13 = vld [vmem:[#allocation7 + $0x8] sm:$0xff]  ;;  %v412_v20 = vpack.c.bf16 %v84_v10, %v83_v9 }
  0x3a   :  { %403 = vmatpush3.bf16.msra.mxu0 %v400_v3  ;;  %362 = vmatprep.mubr.f32.mxu0 %v75_v11  ;;  %v95_v14 = vld [vmem:[#allocation7 + $0x10] sm:$0xff]  ;;  %v432_v15 = vpack.c.bf16 %v94_v13, %v93_v12  ;;  %v96_v16 = vld [vmem:[#allocation7 + $0x18] sm:$0xff]  ;;  %v97_v18 = vld [vmem:[#allocation7 + $0x20] sm:$0xff] }
  0x3b   :  { %405 = vmatprep.subr.bf16.mxu0 %v404_v5  ;;  %v436_v17 = vpack.c.bf16 %v96_v16, %v95_v14  ;;  %v98_v19 = vld [vmem:[#allocation7 + $0x28] sm:$0xff]  ;;  %v85_v21 = vld [vmem:[#allocation5 + $0x40] sm:$0xff]  ;;  %v99_v24 = vld [vmem:[#allocation7 + $0x30] sm:$0xff] }
  0x3c   :  { %433 = vmatprep.subr.bf16.mxu1 %v432_v15  ;;  %v86_v22 = vld [vmem:[#allocation5 + $0x48] sm:$0xff]  ;;  %v440_v23 = vpack.c.bf16 %v98_v19, %v97_v18  ;;  %v100_v25 = vld [vmem:[#allocation7 + $0x38] sm:$0xff]  ;;  %v87_v27 = vld [vmem:[#allocation5 + $0x50] sm:$0xff] }
  0x3d   :  { %435 = vmatpush3.bf16.msra.mxu1 %v432_v15  ;;  %v416_v26 = vpack.c.bf16 %v86_v22, %v85_v21  ;;  %v88_v28 = vld [vmem:[#allocation5 + $0x58] sm:$0xff]  ;;  %v444_v29 = vpack.c.bf16 %v100_v25, %v99_v24  ;;  %v101_v30 = vld [vmem:[#allocation7 + $0x40] sm:$0xff]  ;;  %v102_v31 = vld [vmem:[#allocation7 + $0x48] sm:$0xff] }
  0x3e   :  { %407 = vmatpush3.bf16.msra.mxu0 %v404_v5  ;;  %437 = vmatprep.subr.bf16.mxu1 %v436_v17  ;;  %v420_v32 = vpack.c.bf16 %v88_v28, %v87_v27  ;;  %v89_v33 = vld [vmem:[#allocation5 + $0x60] sm:$0xff]  ;;  %v90_v34 = vld [vmem:[#allocation5 + $0x68] sm:$0xff]  ;;  %v448_v35 = vpack.c.bf16 %v102_v31, %v101_v30  ;;  %v103_v36 = vld [vmem:[#allocation7 + $0x50] sm:$0xff] }
  0x3f   :  { %409 = vmatprep.subr.bf16.mxu0 %v408_v8  ;;  %v104_v37 = vld [vmem:[#allocation7 + $0x58] sm:$0xff]  ;;  %v424_v38 = vpack.c.bf16 %v90_v34, %v89_v33  ;;  %v91_v39 = vld [vmem:[#allocation5 + $0x70] sm:$0xff]  ;;  %v105_v42 = vld [vmem:[#allocation7 + $0x60] sm:$0xff] }
  0x40   :  { %v92_v40 = vld [vmem:[#allocation5 + $0x78] sm:$0xff]  ;;  %v452_v41 = vpack.c.bf16 %v104_v37, %v103_v36  ;;  %v106_v43 = vld [vmem:[#allocation7 + $0x68] sm:$0xff]  ;;  %v107_v47 = vld [vmem:[#allocation7 + $0x70] sm:$0xff] }
  0x41   :  { %439 = vmatpush3.bf16.msra.mxu1 %v436_v17  ;;  %v428_v44 = vpack.c.bf16 %v92_v40, %v91_v39  ;;  %v456_v45 = vpack.c.bf16 %v106_v43, %v105_v42  ;;  %v76_v46 = vld [vmem:[#allocation2 + $0x8] sm:$0xff]  ;;  %v293_v50 = vld [vmem:[%s675_s2] ss:$0 sm:$0xff]  ;;  %s536_s2 = scalar_lea.vmem %s280_s10, 256 }
  0x42   :  { %411 = vmatpush3.bf16.msra.mxu0 %v408_v8  ;;  %441 = vmatprep.subr.bf16.mxu1 %v440_v23  ;;  %v108_v48 = vld [vmem:[#allocation7 + $0x78] sm:$0xff]  ;;  %v292_v57 = vld [vmem:[%s677_s4] ss:$0 sm:$0xff]  ;;  %p537_p10 = scmp.ne.s32.totalorder %s280_s10, %s536_s2  ;;  %p542_p12 = scmp.lt.s32.totalorder %s536_s2, %s536_s2 }
  0x43   :  { %413 = vmatprep.subr.bf16.mxu0 %v412_v20  ;;  %v460_v49 = vpack.c.bf16 %v108_v48, %v107_v47 }
  0x44   :  { %p543_p13 = por %p542_p12, %p541_p11 }
  0x45   :  { %443 = vmatpush3.bf16.msra.mxu1 %v440_v23 }
  0x46   :  { %415 = vmatpush3.bf16.msra.mxu0 %v412_v20  ;;  %445 = vmatprep.subr.bf16.mxu1 %v444_v29  ;;  %p544_p0 = pnand %p543_p13, %p537_p10 }
  0x47   :  { %417 = vmatprep.subr.bf16.mxu0 %v416_v26 }
  0x49   :  { %447 = vmatpush3.bf16.msra.mxu1 %v444_v29 }
  0x4a   :  { %419 = vmatpush3.bf16.msra.mxu0 %v416_v26  ;;  %449 = vmatprep.subr.bf16.mxu1 %v448_v35 }
  0x4b   :  { %421 = vmatprep.subr.bf16.mxu0 %v420_v32 }
  0x4d   :  { %451 = vmatpush3.bf16.msra.mxu1 %v448_v35 }
  0x4e   :  { %423 = vmatpush3.bf16.msra.mxu0 %v420_v32  ;;  %453 = vmatprep.subr.bf16.mxu1 %v452_v41 }
  0x4f   :  { %425 = vmatprep.subr.bf16.mxu0 %v424_v38 }
  0x51   :  { %455 = vmatpush3.bf16.msra.mxu1 %v452_v41 }
  0x52   :  { %427 = vmatpush3.bf16.msra.mxu0 %v424_v38  ;;  %457 = vmatprep.subr.bf16.mxu1 %v456_v45 }
  0x53   :  { %429 = vmatprep.subr.bf16.mxu0 %v428_v44 }
  0x55   :  { %459 = vmatpush3.bf16.msra.mxu1 %v456_v45 }
  0x56   :  { %431 = vmatpush3.bf16.msra.mxu0 %v428_v44  ;;  %461 = vmatprep.subr.bf16.mxu1 %v460_v49 }
  0x59   :  { %363 = vmatmul.mubr.f32.vlgmr.msra.gmra.mrb[0].mxu0 %v76_v46  ;;  %463 = vmatpush3.bf16.msra.mxu1 %v460_v49 }
 0x12c   :  { %v364_v51 = vpop.f32.mrb[0].mxu0 }
 0x12d   :  { %v188_v52 = vadd.f32 %v364_v51, %v293_v50  ;;  %v182_v53 = vpop.f32.mrb[1].mxu0 }
 0x12e   :  { %v183_v54 = vadd.f32 %v293_v50, %v182_v53 }
 0x12f   :  { %v192_v56 = vmax.f32 %v188_v52, 0.0 }
 0x130   :  { %v191_v55 = vmax.f32 %v183_v54, 0.0 }
 0x132   :  { %397 = vmatprep.mubr.f32.mxu1 %v191_v55 }
 0x133   :  { %398 = vmatmul.mubr.f32.vlgmr.msra.gmra.mrb[0].mxu1 %v192_v56 }
 0x206   :  { %v399_v58 = vpop.f32.mrb[0].mxu1 }
 0x207   :  { %v271_v59 = vadd.f32 %v399_v58, %v292_v57  ;;  %v261_v60 = vpop.f32.mrb[1].mxu1 }
 0x208   :  { %v270_v61 = vadd.f32 %v292_v57, %v261_v60 }
 0x209   :  { %273 = vst [vmem:[#allocation8 + $0x8] sm:$0xff] %v271_v59 }
 0x20a   :  { %272 = vst [vmem:[#allocation8] sm:$0xff] %v270_v61 }
 0x20b   :  { %547 = shalt.err (!%p544_p0)
}
 0x20c   :  { %s548_s4 = scalar_lea.hbm %s678_s5, 256 }
 0x20d   :  { %p549_p1 = scmp.ne.s32.totalorder %s678_s5, %s548_s4  ;;  %p552_p2 = scmp.lt.u32.totalorder %s548_s4, %s678_s5 }
 0x20f   :  { %p554_p3 = pnand %p552_p2, %p549_p1 }
 0x211   :  { %557 = shalt.err (!%p554_p3)
}
 0x212   :  { %285 = dma.vmem_to_hbm [thread:$0]  %s280_s10, 256, %s678_s5, [#allocation4], %s566_s30, %s566_s30, %s567_s6  }
 0x213   :  { %562 = dma.done.wait [#allocation4], 256  }
 0x214   :  { %563 = vsyncadd [#allocation4], 4294967040 }
 0x215   :  { %289 = vsyncpa [#allocation3], 1 }
 0x216   :  { %290 = vsyncpa [#allocation6], 1 }
 0x217   :  { %291 = vsyncpa [#allocation4], 1 }

// kernel: tpu_custom_call.1
= control target key start
LH: loop header
LB: loop body
LE: loop exit
PB: predicated region body
PF: predicated region fallthrough
CT: control target
= control target key end

     0   :  { %10 = vsyncpa [#allocation3], 0  ;;  %s673_s0 = inlined_call_operand.hbm [shape: f32[16,128], index: 0, kind: input, shape index: {}]   ;;  %s674_s1 = inlined_call_operand.hbm [shape: f32[128,128], index: 1, kind: input, shape index: {}]   ;;  %s675_s2 = inlined_call_operand.vmem [shape: f32[1,128], index: 2, kind: input, shape index: {}]   ;;  %s676_s3 = inlined_call_operand.hbm [shape: f32[128,128], index: 3, kind: input, shape index: {}]   ;;  %s677_s4 = inlined_call_operand.vmem [shape: f32[1,128], index: 4, kind: input, shape index: {}]   ;;  %s678_s5 = inlined_call_operand.hbm [shape: f32[16,128], index: 5, kind: output, shape index: {}]  }
   0x1   :  { %11 = vsyncpa [#allocation6], 0 }
   0x2   :  { %12 = vsyncpa [#allocation4], 0  ;;  %s564_s18 = smov [#allocation5]   ;;  %s565_s20 = smov [#allocation2]  }
   0x3   :  { %s30_s19 = sshll.u32 %s564_s18, 4  ;;  %s18_s21 = sshll.u32 %s565_s20, 4  ;;  %s31_s19 = int_to_ptr.vmem [resolvable:$true] %s30_s19  ;;  %s600_s21 = int_to_ptr.vmem [resolvable:$true] %s18_s21 }
   0x4   :  { %s470_s24 = scalar_lea.hbm %s674_s1, 2048 }
   0x5   :  { %p471_p0 = scmp.ne.s32.totalorder %s674_s1, %s470_s24  ;;  %p474_p1 = scmp.lt.u32.totalorder %s470_s24, %s674_s1 }
   0x7   :  { %p476_p2 = pnand %p474_p1, %p471_p0 }
   0x9   :  { %479 = shalt.err (!%p476_p2)
}
   0xa   :  { %s480_s29 = scalar_lea.vmem %s31_s19, 2048  ;;  %p485_p4 = scmp.lt.s32.totalorder %s31_s19, %s31_s19 }
   0xb   :  { %p481_p3 = scmp.ne.s32.totalorder %s31_s19, %s480_s29  ;;  %p486_p5 = scmp.lt.s32.totalorder %s480_s29, %s480_s29 }
   0xd   :  { %p487_p6 = por %p486_p5, %p485_p4 }
   0xf   :  { %p488_p7 = pnand %p487_p6, %p481_p3 }
  0x11   :  { %491 = shalt.err (!%p488_p7)
}
  0x12   :  { %s566_s30 = smov 128   ;;  %s567_s6 = smov 8  }
  0x13   :  { %36 = dma.hbm_to_vmem [thread:$0]  %s674_s1, 2048, %s31_s19, [#allocation6], %s566_s30, %s566_s30, %s567_s6  }
  0x14   :  { %s492_s11 = scalar_lea.hbm %s673_s0, 256 }
  0x15   :  { %p493_p8 = scmp.ne.s32.totalorder %s673_s0, %s492_s11  ;;  %p496_p9 = scmp.lt.u32.totalorder %s492_s11, %s673_s0 }
  0x17   :  { %p498_p10 = pnand %p496_p9, %p493_p8 }
  0x19   :  { %501 = shalt.err (!%p498_p10)
}
  0x1a   :  { %s502_s16 = scalar_lea.vmem %s600_s21, 256  ;;  %p507_p12 = scmp.lt.s32.totalorder %s600_s21, %s600_s21 }
  0x1b   :  { %p503_p11 = scmp.ne.s32.totalorder %s600_s21, %s502_s16  ;;  %p508_p13 = scmp.lt.s32.totalorder %s502_s16, %s502_s16 }
  0x1d   :  { %p509_p0 = por %p508_p13, %p507_p12 }
  0x1f   :  { %p510_p1 = pnand %p509_p0, %p503_p11 }
  0x21   :  { %513 = shalt.err (!%p510_p1)
}
  0x22   :  { %24 = dma.hbm_to_vmem [thread:$0]  %s673_s0, 256, %s600_s21, [#allocation3], %s566_s30, %s566_s30, %s567_s6  }
  0x23   :  { %s568_s18 = smov [#allocation7]   ;;  %s514_s23 = scalar_lea.hbm %s676_s3, 2048 }
  0x24   :  { %s44_s19 = sshll.u32 %s568_s18, 4  ;;  %p515_p2 = scmp.ne.s32.totalorder %s676_s3, %s514_s23  ;;  %s45_s19 = int_to_ptr.vmem [resolvable:$true] %s44_s19 }
  0x25   :  { %p518_p3 = scmp.lt.u32.totalorder %s514_s23, %s676_s3 }
  0x27   :  { %p520_p4 = pnand %p518_p3, %p515_p2 }
  0x29   :  { %523 = shalt.err (!%p520_p4)
}
  0x2a   :  { %s524_s28 = scalar_lea.vmem %s45_s19, 2048  ;;  %p529_p6 = scmp.lt.s32.totalorder %s45_s19, %s45_s19 }
  0x2b   :  { %p525_p5 = scmp.ne.s32.totalorder %s45_s19, %s524_s28  ;;  %p530_p7 = scmp.lt.s32.totalorder %s524_s28, %s524_s28 }
  0x2d   :  { %p531_p8 = por %p530_p7, %p529_p6 }
  0x2f   :  { %p532_p9 = pnand %p531_p8, %p525_p5 }
  0x31   :  { %535 = shalt.err (!%p532_p9)
}
  0x32   :  { %50 = dma.hbm_to_vmem [thread:$0]  %s676_s3, 2048, %s45_s19, [#allocation6], %s566_s30, %s566_s30, %s567_s6  }
  0x33   :  { %558 = dma.done.wait [#allocation3], 256  }
  0x34   :  { %559 = vsyncadd [#allocation3], 4294967040 }
  0x35   :  { %560 = dma.done.wait [#allocation6], 4096  }
  0x36   :  { %561 = vsyncadd [#allocation6], 4294963200  ;;  %v77_v0 = vld [vmem:[#allocation5] sm:$0xff]  ;;  %v78_v1 = vld [vmem:[#allocation5 + $0x8] sm:$0xff]  ;;  %s569_s9 = smov [#allocation8]  }
  0x37   :  { %v79_v2 = vld [vmem:[#allocation5 + $0x10] sm:$0xff]  ;;  %v400_v3 = vpack.c.bf16 %v78_v1, %v77_v0  ;;  %v80_v4 = vld [vmem:[#allocation5 + $0x18] sm:$0xff]  ;;  %v81_v6 = vld [vmem:[#allocation5 + $0x20] sm:$0xff]  ;;  %s279_s10 = sshll.u32 %s569_s9, 4  ;;  %s280_s10 = int_to_ptr.vmem [resolvable:$true] %s279_s10 }
  0x38   :  { %v404_v5 = vpack.c.bf16 %v80_v4, %v79_v2  ;;  %v82_v7 = vld [vmem:[#allocation5 + $0x28] sm:$0xff]  ;;  %v83_v9 = vld [vmem:[#allocation5 + $0x30] sm:$0xff]  ;;  %v84_v10 = vld [vmem:[#allocation5 + $0x38] sm:$0xff]  ;;  %p541_p11 = scmp.lt.s32.totalorder %s280_s10, %s280_s10 }
  0x39   :  { %401 = vmatprep.subr.bf16.mxu0 %v400_v3  ;;  %v408_v8 = vpack.c.bf16 %v82_v7, %v81_v6  ;;  %v75_v11 = vld [vmem:[#allocation2] sm:$0xff]  ;;  %v93_v12 = vld [vmem:[#allocation7] sm:$0xff]  ;;  %v94_v13 = vld [vmem:[#allocation7 + $0x8] sm:$0xff]  ;;  %v412_v20 = vpack.c.bf16 %v84_v10, %v83_v9 }
  0x3a   :  { %403 = vmatpush3.bf16.msra.mxu0 %v400_v3  ;;  %362 = vmatprep.mubr.f32.mxu0 %v75_v11  ;;  %v95_v14 = vld [vmem:[#allocation7 + $0x10] sm:$0xff]  ;;  %v432_v15 = vpack.c.bf16 %v94_v13, %v93_v12  ;;  %v96_v16 = vld [vmem:[#allocation7 + $0x18] sm:$0xff]  ;;  %v97_v18 = vld [vmem:[#allocation7 + $0x20] sm:$0xff] }
  0x3b   :  { %405 = vmatprep.subr.bf16.mxu0 %v404_v5  ;;  %v436_v17 = vpack.c.bf16 %v96_v16, %v95_v14  ;;  %v98_v19 = vld [vmem:[#allocation7 + $0x28] sm:$0xff]  ;;  %v85_v21 = vld [vmem:[#allocation5 + $0x40] sm:$0xff]  ;;  %v99_v24 = vld [vmem:[#allocation7 + $0x30] sm:$0xff] }
  0x3c   :  { %433 = vmatprep.subr.bf16.mxu1 %v432_v15  ;;  %v86_v22 = vld [vmem:[#allocation5 + $0x48] sm:$0xff]  ;;  %v440_v23 = vpack.c.bf16 %v98_v19, %v97_v18  ;;  %v100_v25 = vld [vmem:[#allocation7 + $0x38] sm:$0xff]  ;;  %v87_v27 = vld [vmem:[#allocation5 + $0x50] sm:$0xff] }
  0x3d   :  { %435 = vmatpush3.bf16.msra.mxu1 %v432_v15  ;;  %v416_v26 = vpack.c.bf16 %v86_v22, %v85_v21  ;;  %v88_v28 = vld [vmem:[#allocation5 + $0x58] sm:$0xff]  ;;  %v444_v29 = vpack.c.bf16 %v100_v25, %v99_v24  ;;  %v101_v30 = vld [vmem:[#allocation7 + $0x40] sm:$0xff]  ;;  %v102_v31 = vld [vmem:[#allocation7 + $0x48] sm:$0xff] }
  0x3e   :  { %407 = vmatpush3.bf16.msra.mxu0 %v404_v5  ;;  %437 = vmatprep.subr.bf16.mxu1 %v436_v17  ;;  %v420_v32 = vpack.c.bf16 %v88_v28, %v87_v27  ;;  %v89_v33 = vld [vmem:[#allocation5 + $0x60] sm:$0xff]  ;;  %v90_v34 = vld [vmem:[#allocation5 + $0x68] sm:$0xff]  ;;  %v448_v35 = vpack.c.bf16 %v102_v31, %v101_v30  ;;  %v103_v36 = vld [vmem:[#allocation7 + $0x50] sm:$0xff] }
  0x3f   :  { %409 = vmatprep.subr.bf16.mxu0 %v408_v8  ;;  %v104_v37 = vld [vmem:[#allocation7 + $0x58] sm:$0xff]  ;;  %v424_v38 = vpack.c.bf16 %v90_v34, %v89_v33  ;;  %v91_v39 = vld [vmem:[#allocation5 + $0x70] sm:$0xff]  ;;  %v105_v42 = vld [vmem:[#allocation7 + $0x60] sm:$0xff] }
  0x40   :  { %v92_v40 = vld [vmem:[#allocation5 + $0x78] sm:$0xff]  ;;  %v452_v41 = vpack.c.bf16 %v104_v37, %v103_v36  ;;  %v106_v43 = vld [vmem:[#allocation7 + $0x68] sm:$0xff]  ;;  %v107_v47 = vld [vmem:[#allocation7 + $0x70] sm:$0xff] }
  0x41   :  { %439 = vmatpush3.bf16.msra.mxu1 %v436_v17  ;;  %v428_v44 = vpack.c.bf16 %v92_v40, %v91_v39  ;;  %v456_v45 = vpack.c.bf16 %v106_v43, %v105_v42  ;;  %v76_v46 = vld [vmem:[#allocation2 + $0x8] sm:$0xff]  ;;  %v293_v50 = vld [vmem:[%s675_s2] ss:$0 sm:$0xff]  ;;  %s536_s2 = scalar_lea.vmem %s280_s10, 256 }
  0x42   :  { %411 = vmatpush3.bf16.msra.mxu0 %v408_v8  ;;  %441 = vmatprep.subr.bf16.mxu1 %v440_v23  ;;  %v108_v48 = vld [vmem:[#allocation7 + $0x78] sm:$0xff]  ;;  %v292_v57 = vld [vmem:[%s677_s4] ss:$0 sm:$0xff]  ;;  %p537_p10 = scmp.ne.s32.totalorder %s280_s10, %s536_s2  ;;  %p542_p12 = scmp.lt.s32.totalorder %s536_s2, %s536_s2 }
  0x43   :  { %413 = vmatprep.subr.bf16.mxu0 %v412_v20  ;;  %v460_v49 = vpack.c.bf16 %v108_v48, %v107_v47 }
  0x44   :  { %p543_p13 = por %p542_p12, %p541_p11 }
  0x45   :  { %443 = vmatpush3.bf16.msra.mxu1 %v440_v23 }
  0x46   :  { %415 = vmatpush3.bf16.msra.mxu0 %v412_v20  ;;  %445 = vmatprep.subr.bf16.mxu1 %v444_v29  ;;  %p544_p0 = pnand %p543_p13, %p537_p10 }
  0x47   :  { %417 = vmatprep.subr.bf16.mxu0 %v416_v26 }
  0x49   :  { %447 = vmatpush3.bf16.msra.mxu1 %v444_v29 }
  0x4a   :  { %419 = vmatpush3.bf16.msra.mxu0 %v416_v26  ;;  %449 = vmatprep.subr.bf16.mxu1 %v448_v35 }
  0x4b   :  { %421 = vmatprep.subr.bf16.mxu0 %v420_v32 }
  0x4d   :  { %451 = vmatpush3.bf16.msra.mxu1 %v448_v35 }
  0x4e   :  { %423 = vmatpush3.bf16.msra.mxu0 %v420_v32  ;;  %453 = vmatprep.subr.bf16.mxu1 %v452_v41 }
  0x4f   :  { %425 = vmatprep.subr.bf16.mxu0 %v424_v38 }
  0x51   :  { %455 = vmatpush3.bf16.msra.mxu1 %v452_v41 }
  0x52   :  { %427 = vmatpush3.bf16.msra.mxu0 %v424_v38  ;;  %457 = vmatprep.subr.bf16.mxu1 %v456_v45 }
  0x53   :  { %429 = vmatprep.subr.bf16.mxu0 %v428_v44 }
  0x55   :  { %459 = vmatpush3.bf16.msra.mxu1 %v456_v45 }
  0x56   :  { %431 = vmatpush3.bf16.msra.mxu0 %v428_v44  ;;  %461 = vmatprep.subr.bf16.mxu1 %v460_v49 }
  0x59   :  { %363 = vmatmul.mubr.f32.vlgmr.msra.gmra.mrb[0].mxu0 %v76_v46  ;;  %463 = vmatpush3.bf16.msra.mxu1 %v460_v49 }
 0x12c   :  { %v364_v51 = vpop.f32.mrb[0].mxu0 }
 0x12d   :  { %v188_v52 = vadd.f32 %v364_v51, %v293_v50  ;;  %v182_v53 = vpop.f32.mrb[1].mxu0 }
 0x12e   :  { %v183_v54 = vadd.f32 %v293_v50, %v182_v53 }
 0x12f   :  { %v192_v56 = vmax.f32 %v188_v52, 0.0 }
 0x130   :  { %v191_v55 = vmax.f32 %v183_v54, 0.0 }
 0x132   :  { %397 = vmatprep.mubr.f32.mxu1 %v191_v55 }
 0x133   :  { %398 = vmatmul.mubr.f32.vlgmr.msra.gmra.mrb[0].mxu1 %v192_v56 }
 0x206   :  { %v399_v58 = vpop.f32.mrb[0].mxu1 }
 0x207   :  { %v271_v59 = vadd.f32 %v399_v58, %v292_v57  ;;  %v261_v60 = vpop.f32.mrb[1].mxu1 }
 0x208   :  { %v270_v61 = vadd.f32 %v292_v57, %v261_v60 }
 0x209   :  { %273 = vst [vmem:[#allocation8 + $0x8] sm:$0xff] %v271_v59 }
 0x20a   :  { %272 = vst [vmem:[#allocation8] sm:$0xff] %v270_v61 }
 0x20b   :  { %547 = shalt.err (!%p544_p0)
}
 0x20c   :  { %s548_s4 = scalar_lea.hbm %s678_s5, 256 }
 0x20d   :  { %p549_p1 = scmp.ne.s32.totalorder %s678_s5, %s548_s4  ;;  %p552_p2 = scmp.lt.u32.totalorder %s548_s4, %s678_s5 }
 0x20f   :  { %p554_p3 = pnand %p552_p2, %p549_p1 }
 0x211   :  { %557 = shalt.err (!%p554_p3)
}
 0x212   :  { %285 = dma.vmem_to_hbm [thread:$0]  %s280_s10, 256, %s678_s5, [#allocation4], %s566_s30, %s566_s30, %s567_s6  }
 0x213   :  { %562 = dma.done.wait [#allocation4], 256  }
 0x214   :  { %563 = vsyncadd [#allocation4], 4294967040 }
 0x215   :  { %289 = vsyncpa [#allocation3], 1 }
 0x216   :  { %290 = vsyncpa [#allocation6], 1 }
 0x217   :  { %291 = vsyncpa [#allocation4], 1 }

</bundles_post_ra>
